<compile_context>
chip_gen: v5e
topology: v5e:2x2
jax: 0.10.0
libtpu: 0.0.40
codegen_flags: <defaults>
</compile_context>

<pallas_src>
from functools import partial

import jax
import jax.numpy as jnp
from jax.experimental import pallas as pl
from jax.experimental.pallas import tpu as pltpu


DEFAULT_TERM_WEIGHTINGS = {
    "zls_term": 3000.0,
    "eikonal_term": 50.0,
    "approx_sdf_term": 100.0,
    "sign_term": 100.0,
}

# Lane indices inside the single (1, 128) output row.
_L_ZLS, _L_EIK, _L_SDF, _L_SIGN = 0, 1, 2, 3
_L_W_ZLS, _L_W_EIK, _L_W_SDF, _L_W_SIGN = 4, 5, 6, 7
_L_LOSS = 8
_OUT_LANES = 128  # lane-dense output -> unmasked vst + one writeback DMA


def _oginr_loss_kernel(
    slab_ref,   # (R_total, 128) f32: [pcd_pred | approx_sdf | domain_pred |
                #                      nonsurf_pred | signs | surf_pred]
    grad_ref,   # (dims, Rg, 128) f32: dims-major merged domain+pcd gradients
    out_ref,    # (1, 128) f32 output row
    *,
    o_pcd, r_pcd,
    o_asdf, o_dpred, r_dom,
    o_non, o_sgn, r_non,
    o_srf, r_srf,
    inv_pcd, inv_grad, inv_dom, inv_lf,
    grad_pad,
    w_zls, w_eik, w_sdf, w_sign,
):
    # ---- per-term (1,128) lane partials: axis-0 sums are vreg-aligned VPU adds ----
    # zls: mean(|pcd_pred|); zero padding contributes |0| = 0.
    zls_p = jnp.sum(jnp.abs(slab_ref[o_pcd:o_pcd + r_pcd, :]),
                    axis=0, keepdims=True)

    # approx sdf: mean(|approx_sdf - domain_pred|); both padded with 0 -> 0.
    sdf_p = jnp.sum(
        jnp.abs(slab_ref[o_asdf:o_asdf + r_dom, :]
                - slab_ref[o_dpred:o_dpred + r_dom, :]),
        axis=0, keepdims=True)

    # sign term: outside (s==+1): max(-pred, 0); else: max(pred, 0).
    # Padding (s=0, pred=0) falls in the "else" branch and contributes 0.
    nsp = slab_ref[o_non:o_non + r_non, :]
    sgn = slab_ref[o_sgn:o_sgn + r_non, :]
    sign_p = jnp.sum(
        jnp.where(sgn == 1.0, jnp.maximum(-nsp, 0.0), jnp.maximum(nsp, 0.0)),
        axis=0, keepdims=True)
    sign_p = sign_p + jnp.sum(
        jnp.maximum(slab_ref[o_srf:o_srf + r_srf, :], 0.0),
        axis=0, keepdims=True)

    # eikonal: mean(| ||grad||_2 - 1 |), dims-major -> sum over axis 0 is
    # pure vreg adds; sqrt goes to the EUP.
    g = grad_ref[...]                                   # (dims, Rg, 128)
    ssq = jnp.sum(g * g, axis=0)                        # (Rg, 128)
    eik_p = jnp.sum(jnp.abs(jnp.sqrt(ssq) - 1.0), axis=0, keepdims=True)

    # ---- four single-vreg cross-lane reduces -> (1,1) scalars ----
    zls = jnp.sum(zls_p, axis=1, keepdims=True) * inv_pcd
    sdf_t = jnp.sum(sdf_p, axis=1, keepdims=True) * inv_dom
    sign_t = jnp.sum(sign_p, axis=1, keepdims=True) * inv_lf
    # each zero-padded gradient column contributes |0 - 1| = 1; subtract exactly.
    eik = (jnp.sum(eik_p, axis=1, keepdims=True) - grad_pad) * inv_grad

    total = zls * w_zls + eik * w_eik + sdf_t * w_sdf + sign_t * w_sign

    # ---- short epilogue: raw terms -> lanes 0-3, weighted -> 4-7, total -> 8 ----
    lane = jax.lax.broadcasted_iota(jnp.int32, (1, _OUT_LANES), 1)
    lane4 = lane % 4
    term_rep = (jnp.where(lane4 == 0, zls, 0.0)
                + jnp.where(lane4 == 1, eik, 0.0)
                + jnp.where(lane4 == 2, sdf_t, 0.0)
                + jnp.where(lane4 == 3, sign_t, 0.0))
    w_rep = (jnp.where(lane4 == 0, w_zls, 0.0)
             + jnp.where(lane4 == 1, w_eik, 0.0)
             + jnp.where(lane4 == 2, w_sdf, 0.0)
             + jnp.where(lane4 == 3, w_sign, 0.0))
    row = (jnp.where(lane < 4, term_rep, 0.0)
           + jnp.where((lane >= 4) & (lane < 8), term_rep * w_rep, 0.0)
           + jnp.where(lane == _L_LOSS, total, 0.0))
    out_ref[...] = row


def _pack_rows(x, row_mult=8):
    """Flatten -> f32 -> zero-pad to a multiple of row_mult*128 elems -> (rows, 128)."""
    x = x.reshape(-1).astype(jnp.float32)
    pad = (-x.shape[0]) % (row_mult * 128)
    if pad:
        x = jnp.pad(x, (0, pad))
    return x.reshape(-1, 128)


def oginr_loss(output_pred, data, term_weightings=None):
    if term_weightings is None:
        term_weightings = DEFAULT_TERM_WEIGHTINGS
    f32 = jnp.float32
    dims = data["domain_points"].shape[-1]

    # --- ONE lane-dense slab: every segment is a multiple of 8 rows -> all
    #     in-kernel slices start on a vreg boundary. ---
    segs = [
        _pack_rows(output_pred["pcd"]["pred"]),            # zls
        _pack_rows(data["domain_approx_sdf"]),              # approx sdf target
        _pack_rows(output_pred["domain"]["pred"]),          # approx sdf pred
        _pack_rows(output_pred["nonsurf_leaf"]["pred"]),    # sign (nonsurf)
        _pack_rows(data["nonsurf_leaf_sample_signs"]),      # sign labels (+-1)
        _pack_rows(output_pred["surf_leaf"]["pred"]),       # sign (surf)
    ]
    rows = [int(s.shape[0]) for s in segs]
    assert rows[1] == rows[2] and rows[3] == rows[4]
    offs = [0]
    for r in rows[:-1]:
        offs.append(offs[-1] + r)
    slab = jnp.concatenate(segs, axis=0)                    # (R_total, 128)

    # --- ONE dims-major gradient slab: one concat, one transpose, one reshape. ---
    dom_g = output_pred["domain"]["grad"].reshape(-1, dims).astype(f32)
    pcd_g = output_pred["pcd"]["grad"].reshape(-1, dims).astype(f32)
    all_g = jnp.concatenate([dom_g, pcd_g], axis=0)          # (Ng, dims)
    n_grad_true = int(all_g.shape[0])
    grad_pad = (-n_grad_true) % 128
    if grad_pad:
        all_g = jnp.pad(all_g, ((0, grad_pad), (0, 0)))
    grad = all_g.T.reshape(dims, -1, 128)                    # (dims, Rg, 128)

    # per-term counts (guarded against empty batches)
    n_pcd = max(1, int(output_pred["pcd"]["pred"].size))
    n_dom = max(1, int(output_pred["domain"]["pred"].size))
    n_lf = max(1, int(data["nonsurf_leaf_samples"].shape[1]
                      + data["surf_leaf_samples"].shape[1]))
    n_grad = max(1, n_grad_true)

    # terms absent from term_weightings are still computed with weight 0
    # (harmless: total matches the reference).
    w_zls = float(term_weightings.get("zls_term", 0.0))
    w_eik = float(term_weightings.get("eikonal_term", 0.0))
    w_sdf = float(term_weightings.get("approx_sdf_term", 0.0))
    w_sign = float(term_weightings.get("sign_term", 0.0))

    vmem = pl.BlockSpec(memory_space=pltpu.MemorySpace.VMEM)

    out = pl.pallas_call(
        partial(
            _oginr_loss_kernel,
            o_pcd=offs[0], r_pcd=rows[0],
            o_asdf=offs[1], o_dpred=offs[2], r_dom=rows[1],
            o_non=offs[3], o_sgn=offs[4], r_non=rows[3],
            o_srf=offs[5], r_srf=rows[5],
            inv_pcd=1.0 / n_pcd, inv_grad=1.0 / n_grad,
            inv_dom=1.0 / n_dom, inv_lf=1.0 / n_lf,
            grad_pad=float(grad_pad),
            w_zls=w_zls, w_eik=w_eik, w_sdf=w_sdf, w_sign=w_sign,
        ),
        out_shape=jax.ShapeDtypeStruct((1, _OUT_LANES), f32),
        in_specs=[vmem, vmem],
        out_specs=vmem,
    )(slab, grad)

    # One slice of the output row; dict entries below are tiny gathers of it.
    row = out[0]
    loss_dict = {}
    if "zls_term" in term_weightings:
        loss_dict["zls_term"] = row[_L_ZLS]
        loss_dict["weighted_zls_term"] = row[_L_W_ZLS]
    if "eikonal_term" in term_weightings:
        loss_dict["eikonal_term"] = row[_L_EIK]
        loss_dict["weighted_eikonal_term"] = row[_L_W_EIK]
    if "approx_sdf_term" in term_weightings:
        loss_dict["approx_sdf_term"] = row[_L_SDF]
        loss_dict["weighted_approx_sdf_term"] = row[_L_W_SDF]
    if "sign_term" in term_weightings:
        loss_dict["sign_term"] = row[_L_SIGN]
        loss_dict["weighted_sign_term"] = row[_L_W_SIGN]
    loss_dict["loss"] = row[_L_LOSS]
    return loss_dict


def _reference_loss(output_pred, data, term_weightings=DEFAULT_TERM_WEIGHTINGS):
    """Pure-JAX reference mirroring the PyTorch forward."""
    dims = data["domain_points"].shape[-1]
    domain_pred = output_pred["domain"]["pred"]
    pcd_pred = output_pred["pcd"]["pred"]
    domain_grad = output_pred["domain"]["grad"].reshape(1, -1, dims)
    pcd_grad = output_pred["pcd"]["grad"]
    surf_lf_pred = output_pred["surf_leaf"]["pred"]
    nonsurf_lf_pred = output_pred["nonsurf_leaf"]["pred"]

    loss = 0.0
    zls = jnp.mean(jnp.abs(pcd_pred))
    loss += zls * term_weightings["zls_term"]

    all_grads = jnp.concatenate([domain_grad, pcd_grad], axis=-2)
    eik = jnp.mean(jnp.abs(jnp.linalg.norm(all_grads, axis=2) - 1.0))
    loss += eik * term_weightings["eikonal_term"]

    sdf_t = jnp.mean(
        jnp.abs(jnp.squeeze(data["domain_approx_sdf"]) - jnp.squeeze(domain_pred))
    )
    loss += sdf_t * term_weightings["approx_sdf_term"]

    is_outside = data["nonsurf_leaf_sample_signs"].reshape(-1) == 1
    num_lf = data["nonsurf_leaf_samples"].shape[1] + data["surf_leaf_samples"].shape[1]
    ns = nonsurf_lf_pred.reshape(-1)
    sign_t = jnp.sum(jnp.where(is_outside, jnp.maximum(-ns, 0.0), 0.0))
    sign_t += jnp.sum(jnp.where(~is_outside, jnp.maximum(ns, 0.0), 0.0))
    sign_t += jnp.sum(jnp.maximum(surf_lf_pred.reshape(-1), 0.0))
    sign_t /= num_lf
    loss += sign_t * term_weightings["sign_term"]
    return loss


if __name__ == "__main__":
    key = jax.random.PRNGKey(0)
    dims = 3
    Nd, Np, Nn, Ns = 256, 128, 64, 64  # domain / pcd / nonsurf-leaf / surf-leaf

    ks = jax.random.split(key, 10)
    data = {
        "domain_points": jax.random.uniform(ks[0], (1, Nd, dims), jnp.float32, -1.0, 1.0),
        "domain_approx_sdf": jax.random.normal(ks[1], (1, Nd, 1), jnp.float32) * 0.3,
        "nonsurf_leaf_samples": jax.random.uniform(ks[2], (1, Nn, dims), jnp.float32, -1.0, 1.0),
        "surf_leaf_samples": jax.random.uniform(ks[3], (1, Ns, dims), jnp.float32, -1.0, 1.0),
        "nonsurf_leaf_sample_signs": jnp.where(
            jax.random.bernoulli(ks[4], 0.5, (1, Nn)), 1, -1
        ).astype(jnp.int32),
    }
    output_pred = {
        "domain": {
            "pred": jax.random.normal(ks[5], (1, Nd, 1), jnp.float32) * 0.2,
            "grad": jax.random.normal(ks[6], (1, Nd, dims), jnp.float32),
        },
        "pcd": {
            "pred": jax.random.normal(ks[7], (1, Np, 1), jnp.float32) * 0.05,
            "grad": jax.random.normal(ks[8], (1, Np, dims), jnp.float32),
        },
        "surf_leaf": {"pred": jax.random.normal(ks[9], (1, Ns, 1), jnp.float32) * 0.1},
        "nonsurf_leaf": {"pred": jax.random.normal(ks[4], (1, Nn, 1), jnp.float32) * 0.1},
    }

    loss_dict = oginr_loss(output_pred, data)
    loss = jax.block_until_ready(loss_dict["loss"])

    ref = jax.block_until_ready(_reference_loss(output_pred, data))
    assert jnp.allclose(loss, ref, rtol=1e-4, atol=1e-4), (loss, ref)

    print("KERNEL_OK")
</pallas_src>

<mosaic_0001>
module attributes {stable_mosaic.version = 11 : i64} {
  func.func @_oginr_loss_kernel(%arg0: memref<48x128xf32, #tpu.memory_space<vmem>>, %arg1: memref<3x3x128xf32, #tpu.memory_space<vmem>>, %arg2: memref<1x128xf32, #tpu.memory_space<vmem>>) attributes {dimension_semantics = [], scalar_prefetch = 0 : i64, scratch_operands = 0 : i64, tpu.core_type = #tpu.core_type<tc>} {
    %c0 = arith.constant 0 : index
    %c0_0 = arith.constant 0 : index
    %0 = vector.load %arg0[%c0, %c0_0] : memref<48x128xf32, #tpu.memory_space<vmem>>, vector<8x128xf32>
    %1 = math.absf %0 : vector<8x128xf32>
    %cst = arith.constant dense<0.000000e+00> : vector<128xf32>
    %2 = vector.multi_reduction <add>, %1, %cst [0] : vector<8x128xf32> to vector<128xf32>
    %3 = vector.shape_cast %2 : vector<128xf32> to vector<1x128xf32>
    %c8 = arith.constant 8 : index
    %c0_1 = arith.constant 0 : index
    %4 = vector.load %arg0[%c8, %c0_1] : memref<48x128xf32, #tpu.memory_space<vmem>>, vector<8x128xf32>
    %c16 = arith.constant 16 : index
    %c0_2 = arith.constant 0 : index
    %5 = vector.load %arg0[%c16, %c0_2] : memref<48x128xf32, #tpu.memory_space<vmem>>, vector<8x128xf32>
    %6 = arith.subf %4, %5 : vector<8x128xf32>
    %7 = math.absf %6 : vector<8x128xf32>
    %cst_3 = arith.constant dense<0.000000e+00> : vector<128xf32>
    %8 = vector.multi_reduction <add>, %7, %cst_3 [0] : vector<8x128xf32> to vector<128xf32>
    %9 = vector.shape_cast %8 : vector<128xf32> to vector<1x128xf32>
    %c24 = arith.constant 24 : index
    %c0_4 = arith.constant 0 : index
    %10 = vector.load %arg0[%c24, %c0_4] : memref<48x128xf32, #tpu.memory_space<vmem>>, vector<8x128xf32>
    %c32 = arith.constant 32 : index
    %c0_5 = arith.constant 0 : index
    %11 = vector.load %arg0[%c32, %c0_5] : memref<48x128xf32, #tpu.memory_space<vmem>>, vector<8x128xf32>
    %cst_6 = arith.constant 1.000000e+00 : f32
    %12 = vector.broadcast %cst_6 : f32 to vector<8x128xf32>
    %13 = arith.cmpf oeq, %11, %12 : vector<8x128xf32>
    %cst_7 = arith.constant 0.000000e+00 : f32
    %14 = vector.broadcast %cst_7 : f32 to vector<8x128xf32>
    %15 = arith.subf %14, %10 : vector<8x128xf32>
    %cst_8 = arith.constant 0.000000e+00 : f32
    %16 = vector.broadcast %cst_8 : f32 to vector<8x128xf32>
    %17 = arith.maximumf %15, %16 : vector<8x128xf32>
    %cst_9 = arith.constant 0.000000e+00 : f32
    %18 = vector.broadcast %cst_9 : f32 to vector<8x128xf32>
    %19 = arith.maximumf %10, %18 : vector<8x128xf32>
    %20 = arith.select %13, %17, %19 : vector<8x128xi1>, vector<8x128xf32>
    %cst_10 = arith.constant dense<0.000000e+00> : vector<128xf32>
    %21 = vector.multi_reduction <add>, %20, %cst_10 [0] : vector<8x128xf32> to vector<128xf32>
    %22 = vector.shape_cast %21 : vector<128xf32> to vector<1x128xf32>
    %c40 = arith.constant 40 : index
    %c0_11 = arith.constant 0 : index
    %23 = vector.load %arg0[%c40, %c0_11] : memref<48x128xf32, #tpu.memory_space<vmem>>, vector<8x128xf32>
    %cst_12 = arith.constant 0.000000e+00 : f32
    %24 = vector.broadcast %cst_12 : f32 to vector<8x128xf32>
    %25 = arith.maximumf %23, %24 : vector<8x128xf32>
    %cst_13 = arith.constant dense<0.000000e+00> : vector<128xf32>
    %26 = vector.multi_reduction <add>, %25, %cst_13 [0] : vector<8x128xf32> to vector<128xf32>
    %27 = vector.shape_cast %26 : vector<128xf32> to vector<1x128xf32>
    %28 = arith.addf %22, %27 : vector<1x128xf32>
    %c0_14 = arith.constant 0 : index
    %c0_15 = arith.constant 0 : index
    %c0_16 = arith.constant 0 : index
    %29 = vector.load %arg1[%c0_14, %c0_15, %c0_16] : memref<3x3x128xf32, #tpu.memory_space<vmem>>, vector<3x3x128xf32>
    %30 = arith.mulf %29, %29 : vector<3x3x128xf32>
    %cst_17 = arith.constant dense<0.000000e+00> : vector<3x128xf32>
    %31 = vector.multi_reduction <add>, %30, %cst_17 [0] : vector<3x3x128xf32> to vector<3x128xf32>
    %32 = math.sqrt %31 : vector<3x128xf32>
    %cst_18 = arith.constant 1.000000e+00 : f32
    %33 = vector.broadcast %cst_18 : f32 to vector<3x128xf32>
    %34 = arith.subf %32, %33 : vector<3x128xf32>
    %35 = math.absf %34 : vector<3x128xf32>
    %cst_19 = arith.constant dense<0.000000e+00> : vector<128xf32>
    %36 = vector.multi_reduction <add>, %35, %cst_19 [0] : vector<3x128xf32> to vector<128xf32>
    %37 = vector.shape_cast %36 : vector<128xf32> to vector<1x128xf32>
    %cst_20 = arith.constant dense<0.000000e+00> : vector<1xf32>
    %38 = vector.multi_reduction <add>, %3, %cst_20 [1] : vector<1x128xf32> to vector<1xf32>
    %39 = vector.shape_cast %38 : vector<1xf32> to vector<1x1xf32>
    %cst_21 = arith.constant 7.812500e-03 : f32
    %40 = vector.broadcast %cst_21 : f32 to vector<1x1xf32>
    %41 = arith.mulf %39, %40 : vector<1x1xf32>
    %cst_22 = arith.constant dense<0.000000e+00> : vector<1xf32>
    %42 = vector.multi_reduction <add>, %9, %cst_22 [1] : vector<1x128xf32> to vector<1xf32>
    %43 = vector.shape_cast %42 : vector<1xf32> to vector<1x1xf32>
    %cst_23 = arith.constant 3.906250e-03 : f32
    %44 = vector.broadcast %cst_23 : f32 to vector<1x1xf32>
    %45 = arith.mulf %43, %44 : vector<1x1xf32>
    %cst_24 = arith.constant dense<0.000000e+00> : vector<1xf32>
    %46 = vector.multi_reduction <add>, %28, %cst_24 [1] : vector<1x128xf32> to vector<1xf32>
    %47 = vector.shape_cast %46 : vector<1xf32> to vector<1x1xf32>
    %cst_25 = arith.constant 7.812500e-03 : f32
    %48 = vector.broadcast %cst_25 : f32 to vector<1x1xf32>
    %49 = arith.mulf %47, %48 : vector<1x1xf32>
    %cst_26 = arith.constant dense<0.000000e+00> : vector<1xf32>
    %50 = vector.multi_reduction <add>, %37, %cst_26 [1] : vector<1x128xf32> to vector<1xf32>
    %51 = vector.shape_cast %50 : vector<1xf32> to vector<1x1xf32>
    %cst_27 = arith.constant 0.000000e+00 : f32
    %52 = vector.broadcast %cst_27 : f32 to vector<1x1xf32>
    %53 = arith.subf %51, %52 : vector<1x1xf32>
    %cst_28 = arith.constant 0.00260416674 : f32
    %54 = vector.broadcast %cst_28 : f32 to vector<1x1xf32>
    %55 = arith.mulf %53, %54 : vector<1x1xf32>
    %cst_29 = arith.constant 3.000000e+03 : f32
    %56 = vector.broadcast %cst_29 : f32 to vector<1x1xf32>
    %57 = arith.mulf %41, %56 : vector<1x1xf32>
    %cst_30 = arith.constant 5.000000e+01 : f32
    %58 = vector.broadcast %cst_30 : f32 to vector<1x1xf32>
    %59 = arith.mulf %55, %58 : vector<1x1xf32>
    %60 = arith.addf %57, %59 : vector<1x1xf32>
    %cst_31 = arith.constant 1.000000e+02 : f32
    %61 = vector.broadcast %cst_31 : f32 to vector<1x1xf32>
    %62 = arith.mulf %45, %61 : vector<1x1xf32>
    %63 = arith.addf %60, %62 : vector<1x1xf32>
    %cst_32 = arith.constant 1.000000e+02 : f32
    %64 = vector.broadcast %cst_32 : f32 to vector<1x1xf32>
    %65 = arith.mulf %49, %64 : vector<1x1xf32>
    %66 = arith.addf %63, %65 : vector<1x1xf32>
    %67 = tpu.iota {dimensions = array<i32: 1>} : vector<1x128xi32>
    %c4_i32 = arith.constant 4 : i32
    %c0_i32 = arith.constant 0 : i32
    %68 = arith.cmpi eq, %c4_i32, %c0_i32 : i32
    %c1_i32 = arith.constant 1 : i32
    %69 = arith.select %68, %c1_i32, %c4_i32 : i32
    %70 = vector.broadcast %69 : i32 to vector<1x128xi32>
    %71 = arith.remsi %67, %70 : vector<1x128xi32>
    %c0_i32_33 = arith.constant 0 : i32
    %72 = vector.broadcast %c0_i32_33 : i32 to vector<1x128xi32>
    %73 = arith.cmpi ne, %71, %72 : vector<1x128xi32>
    %c0_i32_34 = arith.constant 0 : i32
    %74 = vector.broadcast %c0_i32_34 : i32 to vector<1x128xi32>
    %75 = arith.cmpi slt, %71, %74 : vector<1x128xi32>
    %c0_i32_35 = arith.constant 0 : i32
    %76 = arith.cmpi slt, %69, %c0_i32_35 : i32
    %77 = vector.broadcast %76 : i1 to vector<1x128xi1>
    %78 = vector.broadcast %77 : vector<1x128xi1> to vector<1x128xi1>
    %79 = arith.xori %75, %78 : vector<1x128xi1>
    %80 = arith.andi %79, %73 : vector<1x128xi1>
    %81 = vector.broadcast %69 : i32 to vector<1x128xi32>
    %82 = arith.addi %71, %81 : vector<1x128xi32>
    %83 = arith.select %80, %82, %71 : vector<1x128xi1>, vector<1x128xi32>
    %c0_i32_36 = arith.constant 0 : i32
    %84 = vector.broadcast %c0_i32_36 : i32 to vector<1x128xi32>
    %85 = arith.cmpi eq, %83, %84 : vector<1x128xi32>
    %cst_37 = arith.constant 0.000000e+00 : f32
    %86 = vector.shape_cast %41 : vector<1x1xf32> to vector<1x1xf32>
    %87 = vector.broadcast %86 : vector<1x1xf32> to vector<1x128xf32>
    %88 = vector.broadcast %cst_37 : f32 to vector<1x128xf32>
    %89 = arith.select %85, %87, %88 : vector<1x128xi1>, vector<1x128xf32>
    %c1_i32_38 = arith.constant 1 : i32
    %90 = vector.broadcast %c1_i32_38 : i32 to vector<1x128xi32>
    %91 = arith.cmpi eq, %83, %90 : vector<1x128xi32>
    %cst_39 = arith.constant 0.000000e+00 : f32
    %92 = vector.shape_cast %55 : vector<1x1xf32> to vector<1x1xf32>
    %93 = vector.broadcast %92 : vector<1x1xf32> to vector<1x128xf32>
    %94 = vector.broadcast %cst_39 : f32 to vector<1x128xf32>
    %95 = arith.select %91, %93, %94 : vector<1x128xi1>, vector<1x128xf32>
    %96 = arith.addf %89, %95 : vector<1x128xf32>
    %c2_i32 = arith.constant 2 : i32
    %97 = vector.broadcast %c2_i32 : i32 to vector<1x128xi32>
    %98 = arith.cmpi eq, %83, %97 : vector<1x128xi32>
    %cst_40 = arith.constant 0.000000e+00 : f32
    %99 = vector.shape_cast %45 : vector<1x1xf32> to vector<1x1xf32>
    %100 = vector.broadcast %99 : vector<1x1xf32> to vector<1x128xf32>
    %101 = vector.broadcast %cst_40 : f32 to vector<1x128xf32>
    %102 = arith.select %98, %100, %101 : vector<1x128xi1>, vector<1x128xf32>
    %103 = arith.addf %96, %102 : vector<1x128xf32>
    %c3_i32 = arith.constant 3 : i32
    %104 = vector.broadcast %c3_i32 : i32 to vector<1x128xi32>
    %105 = arith.cmpi eq, %83, %104 : vector<1x128xi32>
    %cst_41 = arith.constant 0.000000e+00 : f32
    %106 = vector.shape_cast %49 : vector<1x1xf32> to vector<1x1xf32>
    %107 = vector.broadcast %106 : vector<1x1xf32> to vector<1x128xf32>
    %108 = vector.broadcast %cst_41 : f32 to vector<1x128xf32>
    %109 = arith.select %105, %107, %108 : vector<1x128xi1>, vector<1x128xf32>
    %110 = arith.addf %103, %109 : vector<1x128xf32>
    %c0_i32_42 = arith.constant 0 : i32
    %111 = vector.broadcast %c0_i32_42 : i32 to vector<1x128xi32>
    %112 = arith.cmpi eq, %83, %111 : vector<1x128xi32>
    %cst_43 = arith.constant 3.000000e+03 : f32
    %cst_44 = arith.constant 0.000000e+00 : f32
    %113 = vector.broadcast %cst_43 : f32 to vector<1x128xf32>
    %114 = vector.broadcast %cst_44 : f32 to vector<1x128xf32>
    %115 = arith.select %112, %113, %114 : vector<1x128xi1>, vector<1x128xf32>
    %c1_i32_45 = arith.constant 1 : i32
    %116 = vector.broadcast %c1_i32_45 : i32 to vector<1x128xi32>
    %117 = arith.cmpi eq, %83, %116 : vector<1x128xi32>
    %cst_46 = arith.constant 5.000000e+01 : f32
    %cst_47 = arith.constant 0.000000e+00 : f32
    %118 = vector.broadcast %cst_46 : f32 to vector<1x128xf32>
    %119 = vector.broadcast %cst_47 : f32 to vector<1x128xf32>
    %120 = arith.select %117, %118, %119 : vector<1x128xi1>, vector<1x128xf32>
    %121 = arith.addf %115, %120 : vector<1x128xf32>
    %c2_i32_48 = arith.constant 2 : i32
    %122 = vector.broadcast %c2_i32_48 : i32 to vector<1x128xi32>
    %123 = arith.cmpi eq, %83, %122 : vector<1x128xi32>
    %cst_49 = arith.constant 1.000000e+02 : f32
    %cst_50 = arith.constant 0.000000e+00 : f32
    %124 = vector.broadcast %cst_49 : f32 to vector<1x128xf32>
    %125 = vector.broadcast %cst_50 : f32 to vector<1x128xf32>
    %126 = arith.select %123, %124, %125 : vector<1x128xi1>, vector<1x128xf32>
    %127 = arith.addf %121, %126 : vector<1x128xf32>
    %c3_i32_51 = arith.constant 3 : i32
    %128 = vector.broadcast %c3_i32_51 : i32 to vector<1x128xi32>
    %129 = arith.cmpi eq, %83, %128 : vector<1x128xi32>
    %cst_52 = arith.constant 1.000000e+02 : f32
    %cst_53 = arith.constant 0.000000e+00 : f32
    %130 = vector.broadcast %cst_52 : f32 to vector<1x128xf32>
    %131 = vector.broadcast %cst_53 : f32 to vector<1x128xf32>
    %132 = arith.select %129, %130, %131 : vector<1x128xi1>, vector<1x128xf32>
    %133 = arith.addf %127, %132 : vector<1x128xf32>
    %c4_i32_54 = arith.constant 4 : i32
    %134 = vector.broadcast %c4_i32_54 : i32 to vector<1x128xi32>
    %135 = arith.cmpi slt, %67, %134 : vector<1x128xi32>
    %cst_55 = arith.constant 0.000000e+00 : f32
    %136 = vector.broadcast %cst_55 : f32 to vector<1x128xf32>
    %137 = arith.select %135, %110, %136 : vector<1x128xi1>, vector<1x128xf32>
    %c4_i32_56 = arith.constant 4 : i32
    %138 = vector.broadcast %c4_i32_56 : i32 to vector<1x128xi32>
    %139 = arith.cmpi sge, %67, %138 : vector<1x128xi32>
    %c8_i32 = arith.constant 8 : i32
    %140 = vector.broadcast %c8_i32 : i32 to vector<1x128xi32>
    %141 = arith.cmpi slt, %67, %140 : vector<1x128xi32>
    %142 = arith.andi %139, %141 : vector<1x128xi1>
    %143 = arith.mulf %110, %133 : vector<1x128xf32>
    %cst_57 = arith.constant 0.000000e+00 : f32
    %144 = vector.broadcast %cst_57 : f32 to vector<1x128xf32>
    %145 = arith.select %142, %143, %144 : vector<1x128xi1>, vector<1x128xf32>
    %146 = arith.addf %137, %145 : vector<1x128xf32>
    %c8_i32_58 = arith.constant 8 : i32
    %147 = vector.broadcast %c8_i32_58 : i32 to vector<1x128xi32>
    %148 = arith.cmpi eq, %67, %147 : vector<1x128xi32>
    %cst_59 = arith.constant 0.000000e+00 : f32
    %149 = vector.shape_cast %66 : vector<1x1xf32> to vector<1x1xf32>
    %150 = vector.broadcast %149 : vector<1x1xf32> to vector<1x128xf32>
    %151 = vector.broadcast %cst_59 : f32 to vector<1x128xf32>
    %152 = arith.select %148, %150, %151 : vector<1x128xi1>, vector<1x128xf32>
    %153 = arith.addf %146, %152 : vector<1x128xf32>
    %c0_60 = arith.constant 0 : index
    %c0_61 = arith.constant 0 : index
    %154 = vector.load %arg2[%c0_60, %c0_61] : memref<1x128xf32, #tpu.memory_space<vmem>>, vector<1x128xf32>
    tpu.vector_store %arg2[%c0_60, %c0_61], %153 {strides = array<i32>} : memref<1x128xf32, #tpu.memory_space<vmem>>, vector<1x128xf32>,
    return
  }
}

</mosaic_0001>

<bundles_post_ra>
// kernel: tpu_custom_call.1
= control target key start
LH: loop header
LB: loop body
LE: loop exit
PB: predicated region body
PF: predicated region fallthrough
CT: control target
= control target key end

     0   :  { %7 = vsyncpa [#allocation3], 0  ;;  %s329_s0 = inlined_call_operand.hbm [shape: f32[48,128], index: 0, kind: input, shape index: {}]   ;;  %s330_s1 = inlined_call_operand.hbm [shape: f32[3,3,128], index: 1, kind: input, shape index: {}]   ;;  %s331_s2 = inlined_call_operand.hbm [shape: f32[1,128], index: 2, kind: output, shape index: {}]  }
   0x1   :  { %8 = vsyncpa [#allocation6], 0 }
   0x2   :  { %9 = vsyncpa [#allocation4], 0  ;;  %s14_s11 = sshll.u32 %s329_s0, 4  ;;  %s287_s12 = smov [#allocation2]   ;;  %s15_s11 = int_to_ptr.hbm [resolvable:$true] %s14_s11 }
   0x3   :  { %s16_s13 = sshll.u32 %s287_s12, 4  ;;  %s27_s16 = sshll.u32 %s330_s1, 4  ;;  %s17_s13 = int_to_ptr.vmem [resolvable:$true] %s16_s13  ;;  %s28_s16 = int_to_ptr.hbm [resolvable:$true] %s27_s16 }
   0x4   :  { %s288_s17 = smov 128   ;;  %s289_s18 = smov 8  }
   0x5   :  { %22 = dma.hbm_to_vmem [thread:$0]  %s15_s11, 768, %s17_s13, [#allocation3], %s288_s17, %s288_s17, %s289_s18  }
   0x6   :  { %s290_s19 = smov [#allocation5]   ;;  %s291_s21 = smov 64  }
   0x7   :  { %s29_s20 = sshll.u32 %s290_s19, 4  ;;  %s292_s22 = smov 4   ;;  %s30_s20 = int_to_ptr.vmem [resolvable:$true] %s29_s20 }
   0x8   :  { %35 = dma.hbm_to_vmem [thread:$0]  %s28_s16, 192, %s30_s20, [#allocation6], %s291_s21, %s291_s21, %s292_s22  }
   0x9   :  { %281 = dma.done.wait [#allocation3], 768  }
   0xa   :  { %282 = vsyncadd [#allocation3], 4294966528 }
   0xb   :  { %283 = dma.done.wait [#allocation6], 192  }
   0xc   :  { %284 = vsyncadd [#allocation6], 4294967104  ;;  %v44_v0 = vld [vmem:[#allocation2] sm:$0xff]  ;;  %v52_v1 = vld [vmem:[#allocation2 + $0x8] sm:$0xff]  ;;  %vm90_vm0 = vcmask 1042432   ;;  %s294_s0 = smov [#allocation7]  }
   0xd   :  { %v53_v2 = vld [vmem:[#allocation2 + $0x10] sm:$0xff]  ;;  %v45_v3 = vand.u32 2147483647, %v44_v0  ;;  %v86_v7 = vld [vmem:[#allocation5 + $0x8] sm:$0x7]  ;;  %v63_v11 = vld [vmem:[#allocation2 + $0x20] sm:$0xff] }
   0xe   :  { %v54_v4 = vsub.f32 %v52_v1, %v53_v2  ;;  %v84_v5 = vld [vmem:[#allocation5] sm:$0x7]  ;;  %v85_v6 = vld [vmem:[#allocation5 + $0x4] sm:$0x7]  ;;  %v62_v10 = vld [vmem:[#allocation2 + $0x18] sm:$0xff]  ;;  %v89_v14 = vmul.f32 %v86_v7, %v86_v7  ;;  %vm64_vm1 = vcmp.eq.f32.partialorder %v63_v11, 1.0 }
   0xf   :  { %v87_v8 = vmul.f32 %v84_v5, %v84_v5  ;;  %v88_v9 = vmul.f32 %v85_v6, %v85_v6  ;;  %v46_v12 = vrot.slane %v45_v3, 4  ;;  %v75_v15 = vld [vmem:[#allocation2 + $0x28] sm:$0xff]  ;;  %v65_v18 = vsub.f32 0.0, %v62_v10  ;;  %s185_s1 = sshll.u32 %s294_s0, 4  ;;  %s187_s25 = sshll.u32 %s331_s2, 4  ;;  %s186_s1 = int_to_ptr.vmem [resolvable:$true] %s185_s1  ;;  %s188_s25 = int_to_ptr.hbm [resolvable:$true] %s187_s25 }
  0x10   :  { %v55_v13 = vand.u32 2147483647, %v54_v4  ;;  %v67_v19 = vmax.f32 %v62_v10, 0.0  ;;  %v94_v23 = vsel %vm90_vm0, %v89_v14, 0.0  ;;  %v76_v25 = vmax.f32 %v75_v15, 0.0 }
  0x11   :  { %v91_v16 = vsel %vm90_vm0, %v87_v8, 0.0  ;;  %v92_v17 = vsel %vm90_vm0, %v88_v9, 0.0  ;;  %v47_v20 = vadd.f32 %v46_v12, %v45_v3  ;;  %v66_v24 = vmax.f32 %v65_v18, 0.0 }
  0x12   :  { %v56_v21 = vrot.slane %v55_v13, 4  ;;  %v93_v22 = vadd.f32 %v92_v17, %v91_v16  ;;  %v77_v30 = vrot.slane %v76_v25, 4  ;;  %v136_v5 = vlaneseq }
  0x13   :  { %v48_v26 = vrot.slane %v47_v20, 2  ;;  %v68_v29 = vsel %vm64_vm1, %v66_v24, %v67_v19  ;;  %v293_v10 = vmov 0.0  }
  0x14   :  { %v57_v27 = vadd.f32 %v56_v21, %v55_v13  ;;  %v95_v28 = vadd.f32 %v94_v23, %v93_v22  ;;  %v69_v33 = vrot.slane %v68_v29, 4  ;;  %v78_v34 = vadd.f32 %v77_v30, %v76_v25 }
  0x15   :  { %v49_v31 = vadd.f32 %v48_v26, %v47_v20  ;;  %v137_v6 = vand.u32 127, %v136_v5 }
  0x16   :  { %v58_v32 = vrot.slane %v57_v27, 2  ;;  %207 = vrsqrt.f32 %v95_v28  ;;  %v70_v37 = vadd.f32 %v69_v33, %v68_v29  ;;  %v79_v38 = vrot.slane %v78_v34, 2 }
  0x17   :  { %v50_v35 = vrot.slane %v49_v31, 1  ;;  %vm103_vm2 = vcmp.eq.f32.partialorder %v95_v28, inf  ;;  %v106_v56 = vand.u32 2147483648, %v95_v28  ;;  %vm105_vm3 = vcmp.eq.f32.partialorder %v95_v28, 0.0 }
  0x18   :  { %v59_v36 = vadd.f32 %v58_v32, %v57_v27  ;;  %v71_v41 = vrot.slane %v70_v37, 2  ;;  %v80_v42 = vadd.f32 %v79_v38, %v78_v34  ;;  %v142_v8 = vand.u32 3, %v137_v6 }
  0x19   :  { %v51_v39 = vadd.f32 %v50_v35, %v49_v31  ;;  %vm170_vm8 = vcmp.ge.s32.totalorder %v137_v6, 4  ;;  %vm171_vm9 = vcmp.lt.s32.totalorder %v137_v6, 8  ;;  %vm168_vm10 = vcmp.lt.s32.totalorder %v137_v6, 4 }
  0x1a   :  { %v60_v40 = vrot.slane %v59_v36, 1  ;;  %v72_v46 = vadd.f32 %v71_v41, %v70_v37  ;;  %v81_v47 = vrot.slane %v80_v42, 1  ;;  %vm152_vm4 = vcmp.eq.s32.totalorder %v142_v8, 1  ;;  %vm172_vm11 = vmand %vm170_vm8, %vm171_vm9 }
  0x1b   :  { %117 = vadd.xlane.f32.xlu0 %v51_v39  ;;  %vm150_vm5 = vcmp.eq.s32.totalorder %v142_v8, 0  ;;  %v162_v12 = vsel %vm152_vm4, 50.0, %v293_v10  ;;  %vm155_vm6 = vcmp.eq.s32.totalorder %v142_v8, 2  ;;  %vm158_vm7 = vcmp.eq.s32.totalorder %v142_v8, 3 }
  0x1c   :  { %v208_v43 = vpop.eup %207  ;;  %v61_v44 = vadd.f32 %v60_v40, %v59_v36  ;;  %v73_v49 = vrot.slane %v72_v46, 1  ;;  %v82_v50 = vadd.f32 %v81_v47, %v80_v42  ;;  %v161_v11 = vsel %vm150_vm5, 3000.0, %v293_v10 }
  0x1d   :  { %v97_v45 = vmul.f32 %v208_v43, %v95_v28  ;;  %v163_v14 = vadd.f32 %v162_v12, %v161_v11  ;;  %v164_v16 = vsel %vm155_vm6, 100.0, %v293_v10  ;;  %v166_v26 = vsel %vm158_vm7, 100.0, %v293_v10 }
  0x1e   :  { %120 = vadd.xlane.f32.xlu1 %v61_v44  ;;  %v74_v52 = vadd.f32 %v73_v49, %v72_v46  ;;  %vm176_vm12 = vcmp.eq.s32.totalorder %v137_v6, 8 }
  0x1f   :  { %v98_v48 = vmul.f32 %v208_v43, %v97_v45  ;;  %v165_v22 = vadd.f32 %v164_v16, %v163_v14 }
  0x20   :  { %v83_v54 = vadd.f32 %v82_v50, %v74_v52 }
  0x21   :  { %v99_v51 = vmul.f32 0.5, %v98_v48  ;;  %v167_v32 = vadd.f32 %v166_v26, %v165_v22 }
  0x23   :  { %v100_v53 = vsub.f32 1.5, %v99_v51 }
  0x25   :  { %v101_v55 = vmul.f32 %v208_v43, %v100_v53 }
  0x26   :  { %123 = vadd.xlane.f32.xlu1 %v83_v54 }
  0x27   :  { %v102_v57 = vmul.f32 %v101_v55, %v95_v28 }
  0x29   :  { %v104_v58 = vsel %vm103_vm2, %v95_v28, %v102_v57 }
  0x2a   :  { %v107_v59 = vsel %vm105_vm3, %v106_v56, %v104_v58 }
  0x2b   :  { %v198_v60 = vadd.f32 -1.0, %v107_v59 }
  0x2d   :  { %v109_v61 = vand.u32 2147483647, %v198_v60 }
  0x2f   :  { %v110_v62 = vsel %vm90_vm0, %v109_v61, 0.0 }
  0x30   :  { %v111_v63 = vrot.slane %v110_v62, 4 }
  0x32   :  { %v112_v0 = vadd.f32 %v111_v63, %v110_v62 }
  0x34   :  { %v113_v1 = vrot.slane %v112_v0, 2 }
  0x36   :  { %v114_v2 = vadd.f32 %v113_v1, %v112_v0 }
  0x38   :  { %v115_v3 = vrot.slane %v114_v2, 1 }
  0x3a   :  { %v116_v4 = vadd.f32 %v115_v3, %v114_v2 }
  0x3c   :  { %126 = vadd.xlane.f32.xlu0 %v116_v4 }
  0x8e   :  { %v118_v9 = vpop.xlane.xlu0 %117 }
  0x8f   :  { %v119_v13 = vmul.f32 0.0078125, %v118_v9 }
  0x91   :  { %v121_v7 = vpop.xlane.xlu1 %120  ;;  %v129_v21 = vmul.f32 3000.0, %v119_v13  ;;  %v151_v23 = vsel %vm150_vm5, %v119_v13, 0.0 }
  0x92   :  { %v122_v17 = vmul.f32 0.00390625, %v121_v7 }
  0x94   :  { %v132_v27 = vmul.f32 100.0, %v122_v17  ;;  %v156_v29 = vsel %vm155_vm6, %v122_v17, 0.0 }
  0x99   :  { %v124_v15 = vpop.xlane.xlu1 %123 }
  0x9a   :  { %v125_v20 = vmul.f32 0.0078125, %v124_v15 }
  0x9c   :  { %v159_v31 = vsel %vm158_vm7, %v125_v20, 0.0  ;;  %v134_v33 = vmul.f32 100.0, %v125_v20 }
  0xaf   :  { %v127_v18 = vpop.xlane.xlu0 %126 }
  0xb0   :  { %v128_v19 = vmul.f32 0.0026041667, %v127_v18 }
  0xb2   :  { %v130_v24 = vmul.f32 50.0, %v128_v19  ;;  %v153_v25 = vsel %vm152_vm4, %v128_v19, 0.0 }
  0xb3   :  { %v154_v28 = vadd.f32 %v153_v25, %v151_v23 }
  0xb4   :  { %v131_v30 = vadd.f32 %v130_v24, %v129_v21 }
  0xb5   :  { %v157_v34 = vadd.f32 %v156_v29, %v154_v28 }
  0xb6   :  { %v133_v35 = vadd.f32 %v132_v27, %v131_v30 }
  0xb7   :  { %v160_v36 = vadd.f32 %v159_v31, %v157_v34 }
  0xb8   :  { %v135_v37 = vadd.f32 %v134_v33, %v133_v35 }
  0xb9   :  { %v173_v38 = vmul.f32 %v167_v32, %v160_v36  ;;  %v169_v39 = vsel %vm168_vm10, %v160_v36, 0.0 }
  0xba   :  { %v177_v42 = vsel %vm176_vm12, %v135_v37, 0.0 }
  0xbb   :  { %v174_v40 = vsel %vm172_vm11, %v173_v38, 0.0 }
  0xbc   :  { %v175_v41 = vadd.f32 %v174_v40, %v169_v39 }
  0xbe   :  { %v178_v43 = vadd.f32 %v177_v42, %v175_v41 }
  0xc0   :  { %179 = vst [vmem:[#allocation7] sm:$0x1] %v178_v43 }
  0xc1   :  { %190 = dma.vmem_to_hbm [thread:$0]  %s186_s1, 16, %s188_s25, [#allocation4]  }
  0xc2   :  { %285 = dma.done.wait [#allocation4], 16  }
  0xc3   :  { %286 = vsyncadd [#allocation4], 4294967280 }
  0xc4   :  { %195 = vsyncpa [#allocation3], 1 }
  0xc5   :  { %196 = vsyncpa [#allocation6], 1 }
  0xc6   :  { %197 = vsyncpa [#allocation4], 1 }

</bundles_post_ra>
